<compile_context>
chip_gen: v6e
topology: v6e:2x2x1
jax: 0.10.0
libtpu: 0.0.40
codegen_flags: <defaults>
</compile_context>

<pallas_src>
import functools

import jax
import jax.numpy as jnp
import numpy as np
from jax.experimental import pallas as pl
from jax.experimental.pallas import tpu as pltpu

LN_EPS = 1e-5


def _fused_ampnet_kernel(*refs, num_layers, tb, group_size):
    """Fully fused AmpNet forward for one batch tile.

    refs layout (all VMEM):
      refs[0]               : x      (2, TB, D0)    slab 0 = real, slab 1 = imag
      refs[1 + 3*l + 0]     : wt_l   (IN_l, OUT_l)  pre-transposed Linear weight
      refs[1 + 3*l + 1]     : bias_l (1, OUT_l)
      refs[1 + 3*l + 2]     : ln_l   (4, OUT_l)     rows = [gamma_real, gamma_imag,
                                                            beta_real,  beta_imag]
      refs[1 + 3*L]         : reg_w  (1, D_last)
      refs[1 + 3*L + 1]     : reg_b  (1, 1)
      refs[-1]              : out    (TB, 1)
    """
    x_ref = refs[0]
    out_ref = refs[-1]
    layer_refs = refs[1:1 + 3 * num_layers]
    reg_w_ref = refs[1 + 3 * num_layers]
    reg_b_ref = refs[2 + 3 * num_layers]

    d0 = x_ref.shape[-1]
    # (2, TB, D0) -> (2*TB, D0): free sublane merge (TB % 8 == 0 by construction).
    x = x_ref[...].reshape(2 * tb, d0)

    for l in range(num_layers):
        wt_ref = layer_refs[3 * l]
        bias_ref = layer_refs[3 * l + 1]
        ln_ref = layer_refs[3 * l + 2]
        out_dim = wt_ref.shape[1]
        num_groups = out_dim // group_size
        inv_g = 1.0 / group_size

        lhs = x if x.dtype == wt_ref.dtype else x.astype(wt_ref.dtype)
        # One MXU matmul for both (real, imag) branches; f32 accumulation.
        y = jnp.dot(lhs, wt_ref[...], preferred_element_type=jnp.float32)
        y = y + bias_ref[...]
        y = jnp.maximum(y, 0.0)                                  # nn.ReLU()

        # Per-group LayerNorm statistics on lane-aligned static slices.
        # Two-pass centered variance (no E[x^2]-mean^2 cancellation after ReLU).
        parts = []
        for g in range(num_groups):
            lo = g * group_size
            yg = y[:, lo:lo + group_size]                        # (2*TB, G)
            mean = jnp.sum(yg, axis=-1, keepdims=True) * inv_g   # XLU reduce
            yc = yg - mean
            var = jnp.sum(yc * yc, axis=-1, keepdims=True) * inv_g
            parts.append(yc * jax.lax.rsqrt(var + LN_EPS))       # rsqrt on EUP
        yn = parts[0] if num_groups == 1 else jnp.concatenate(parts, axis=-1)

        # Affine with per-branch gamma/beta as ONE wide VPU multiply-add
        # (LN params pre-tiled to (4, OUT) at init -> no per-group stores,
        #  no yn[:tb]/yn[tb:] sublane splits).
        ln = ln_ref[...]
        gamma = ln[0:2][:, None, :]                              # (2, 1, OUT)
        beta = ln[2:4][:, None, :]
        y3 = yn.reshape(2, tb, out_dim) * gamma + beta           # free reshape
        x = y3.reshape(2 * tb, out_dim)

    # Regularization head, fused into the same kernel:
    #   out = reg(real) + reg(imag) = (real + imag) @ W^T + 2*b
    xs = x[:tb] + x[tb:]                                         # (TB, D_last)
    y = jnp.sum(xs * reg_w_ref[...], axis=-1, keepdims=True)     # lane reduce
    out_ref[...] = y + 2.0 * reg_b_ref[...]


def _pick_tb(batch8, cap):
    """Largest multiple-of-8 batch tile <= cap that divides the padded batch.
    Small batches get a single grid step (grid is a serial loop on v5e/v6e)."""
    cap = max(8, (cap // 8) * 8)
    if batch8 <= cap:
        return batch8
    tb = cap
    while batch8 % tb:
        tb -= 8
    return tb


def _ampnet_fused_call(x, params, *, group_size, tb):
    _, batch, d0 = x.shape
    layers = params["layers"]
    num_layers = len(layers)
    d_last = layers[-1]["wt"].shape[1]
    grid = (batch // tb,)

    in_specs = [pl.BlockSpec((2, tb, d0), lambda i: (0, i, 0))]
    args = [x]
    for layer in layers:
        in_dim, out_dim = layer["wt"].shape
        assert out_dim % group_size == 0
        # Constant index_maps: blocks stay resident across grid steps (the
        # runtime does not re-issue DMA when the block index is unchanged).
        in_specs.append(pl.BlockSpec((in_dim, out_dim), lambda i: (0, 0)))
        in_specs.append(pl.BlockSpec((1, out_dim), lambda i: (0, 0)))
        in_specs.append(pl.BlockSpec((4, out_dim), lambda i: (0, 0)))
        args += [layer["wt"], layer["bias"], layer["ln"]]
    in_specs.append(pl.BlockSpec((1, d_last), lambda i: (0, 0)))
    in_specs.append(pl.BlockSpec((1, 1), lambda i: (0, 0)))
    args += [params["reg_w"], params["reg_b"]]

    # Advisory cost estimate for XLA's scheduler around the custom call.
    flops = 0
    param_bytes = 0
    total_groups = 0
    for layer in layers:
        in_dim, out_dim = layer["wt"].shape
        flops += 2 * (2 * batch) * in_dim * out_dim
        param_bytes += (layer["wt"].size * layer["wt"].dtype.itemsize
                        + layer["bias"].size * 4 + layer["ln"].size * 4)
        total_groups += out_dim // group_size
    flops += 2 * (2 * batch) * d_last
    param_bytes += (d_last + 1) * 4
    bytes_accessed = 4 * (2 * batch * d0 + batch) + param_bytes
    cost = pl.CostEstimate(flops=flops,
                           transcendentals=2 * batch * total_groups,
                           bytes_accessed=bytes_accessed)

    # Scoped-VMEM budget: double-buffered x/out tiles + resident params +
    # headroom for live f32 intermediates; capped at 32 MiB so it is safe on
    # every generation (v7x: 64 MiB physical / 32 MiB default scoped).
    max_dim = max([d0] + [layer["wt"].shape[1] for layer in layers])
    vmem = (2 * (2 * tb * d0 * 4) + 2 * (tb * 4) + 2 * param_bytes
            + 8 * (2 * tb * max_dim * 4) + (2 << 20))
    vmem = int(min(max(vmem, 8 << 20), 32 << 20))

    kernel = functools.partial(_fused_ampnet_kernel, num_layers=num_layers,
                               tb=tb, group_size=group_size)
    return pl.pallas_call(
        kernel,
        out_shape=jax.ShapeDtypeStruct((batch, 1), jnp.float32),
        grid=grid,
        in_specs=in_specs,
        out_specs=pl.BlockSpec((tb, 1), lambda i: (i, 0)),
        compiler_params=pltpu.CompilerParams(
            dimension_semantics=("parallel",),
            vmem_limit_bytes=vmem),
        cost_estimate=cost,
    )(*args)


@functools.partial(jax.jit, static_argnames=("group_size", "tb_cap"))
def ampnet_forward(real, imag, params, *, group_size, tb_cap=512):
    """JAX wrapper reproducing AmpNet.forward (eval mode)."""
    batch = real.shape[0]
    # Stack real/imag on a leading axis so both branches share one MXU matmul.
    x = jnp.stack([real.reshape(batch, -1), imag.reshape(batch, -1)],
                  axis=0).astype(jnp.float32)                    # (2, B, D0)
    b8 = ((batch + 7) // 8) * 8
    if b8 != batch:                                              # keep sublane merges free
        x = jnp.pad(x, ((0, 0), (0, b8 - batch), (0, 0)))
    tb = _pick_tb(b8, tb_cap)
    out = _ampnet_fused_call(x, params, group_size=group_size, tb=tb)
    return out[:batch]                                           # (B, 1)


def init_params(key, mlp_list, group_size):
    """Deterministic parameters.

    Linear weights pre-transposed once to (IN, OUT); LayerNorm affine params
    pre-tiled to full output width as (4, OUT) = [gamma_real, gamma_imag,
    beta_real, beta_imag] so the kernel's affine is one wide VPU op.
    """
    layers = []
    for in_dim, out_dim in zip(mlp_list[:-1], mlp_list[1:]):
        assert out_dim % group_size == 0
        num_groups = out_dim // group_size
        key, kw, kb, kg = jax.random.split(key, 4)
        w = 0.01 * jax.random.normal(kw, (out_dim, in_dim), jnp.float32)  # N(0, 0.01)
        b = 0.1 * jax.random.normal(kb, (out_dim,), jnp.float32)
        # Non-trivial LayerNorm affine params so norm1 != norm2 is exercised.
        kg1, kb1, kg2, kb2 = jax.random.split(kg, 4)
        gamma1 = 1.0 + 0.1 * jax.random.normal(kg1, (group_size,), jnp.float32)
        beta1 = 0.1 * jax.random.normal(kb1, (group_size,), jnp.float32)
        gamma2 = 1.0 + 0.1 * jax.random.normal(kg2, (group_size,), jnp.float32)
        beta2 = 0.1 * jax.random.normal(kb2, (group_size,), jnp.float32)
        ln = jnp.stack([jnp.tile(gamma1, num_groups),
                        jnp.tile(gamma2, num_groups),
                        jnp.tile(beta1, num_groups),
                        jnp.tile(beta2, num_groups)], axis=0)    # (4, OUT)
        layers.append(dict(wt=w.T, bias=b.reshape(1, out_dim), ln=ln))
    key, kw, kb = jax.random.split(key, 3)
    d_last = mlp_list[-1]
    reg_w = jax.random.normal(kw, (1, d_last), jnp.float32) * np.sqrt(2.0 / (1 + d_last))
    reg_b = 0.05 * jax.random.normal(kb, (1, 1), jnp.float32)
    return dict(layers=layers, reg_w=reg_w, reg_b=reg_b)


def cast_params_bf16(params):
    """Pre-cast Linear weights to bf16 ONCE (outside the jitted forward) for
    the bf16-MXU path; bias / LN / head stay f32 (f32 accumulate + f32 LN)."""
    layers = [dict(l, wt=l["wt"].astype(jnp.bfloat16)) for l in params["layers"]]
    return dict(params, layers=layers)


def _reference(real, imag, params, *, group_size):
    """Pure-JAX reference reproducing the PyTorch forward (eval mode)."""
    batch = real.shape[0]
    r = real.reshape(batch, -1).astype(jnp.float32)
    im = imag.reshape(batch, -1).astype(jnp.float32)

    def amp(x, wt, bias, gamma_full, beta_full):
        y = jnp.maximum(x @ wt + bias, 0.0)                      # Linear + ReLU
        yg = y.reshape(batch, -1, group_size)
        mean = jnp.mean(yg, axis=-1, keepdims=True)
        var = jnp.mean((yg - mean) ** 2, axis=-1, keepdims=True)
        yn = ((yg - mean) / jnp.sqrt(var + LN_EPS)).reshape(batch, -1)
        return yn * gamma_full + beta_full

    for layer in params["layers"]:
        wt = layer["wt"].astype(jnp.float32)
        ln = layer["ln"]
        r = amp(r, wt, layer["bias"], ln[0], ln[2])
        im = amp(im, wt, layer["bias"], ln[1], ln[3])
    out_r = r @ params["reg_w"].T + params["reg_b"]
    out_i = im @ params["reg_w"].T + params["reg_b"]
    return out_r + out_i


if __name__ == "__main__":
    # Synthetic config consistent with AmpNet.__init__:
    #   config.mlp_list = [32, 256, 256], group_hidden_dimension = 128,
    #   dp_rate_amp = 0.1 (identity at inference), Amp activation = ReLU.
    B = 8
    MLP_LIST = [32, 256, 256]
    GROUP = 128

    key = jax.random.PRNGKey(0)
    k_r, k_i, k_p = jax.random.split(key, 3)

    # Inputs: (B, 4, 8) real / imag -> flattened to (B, 32) inside forward.
    real = jax.random.normal(k_r, (B, 4, 8), dtype=jnp.float32)
    imag = jax.random.normal(k_i, (B, 4, 8), dtype=jnp.float32)

    params = init_params(k_p, MLP_LIST, GROUP)

    out = jax.block_until_ready(ampnet_forward(real, imag, params, group_size=GROUP))
    ref = _reference(real, imag, params, group_size=GROUP)
    np.testing.assert_allclose(np.asarray(out), np.asarray(ref), rtol=1e-4, atol=1e-4)
    assert out.shape == (B, 1)

    # Multi-tile grid path (tb_cap=8 -> grid=(3,)) to exercise batch tiling.
    B2 = 24
    real2 = jax.random.normal(jax.random.PRNGKey(1), (B2, 4, 8), dtype=jnp.float32)
    imag2 = jax.random.normal(jax.random.PRNGKey(2), (B2, 4, 8), dtype=jnp.float32)
    out2 = jax.block_until_ready(
        ampnet_forward(real2, imag2, params, group_size=GROUP, tb_cap=8))
    ref2 = _reference(real2, imag2, params, group_size=GROUP)
    np.testing.assert_allclose(np.asarray(out2), np.asarray(ref2), rtol=1e-4, atol=1e-4)

    # Non-multiple-of-8 batch (padded to 16 internally, sliced back).
    B3 = 10
    real3 = jax.random.normal(jax.random.PRNGKey(3), (B3, 4, 8), dtype=jnp.float32)
    imag3 = jax.random.normal(jax.random.PRNGKey(4), (B3, 4, 8), dtype=jnp.float32)
    out3 = jax.block_until_ready(ampnet_forward(real3, imag3, params, group_size=GROUP))
    ref3 = _reference(real3, imag3, params, group_size=GROUP)
    np.testing.assert_allclose(np.asarray(out3), np.asarray(ref3), rtol=1e-4, atol=1e-4)
    assert out3.shape == (B3, 1)

    # Optional bf16-MXU path: weights pre-cast once outside the forward
    # (f32 accumulate + f32 LayerNorm -> looser but bounded numerics).
    params_bf16 = cast_params_bf16(params)
    out_bf16 = jax.block_until_ready(
        ampnet_forward(real, imag, params_bf16, group_size=GROUP))
    assert out_bf16.shape == (B, 1)
    assert bool(jnp.all(jnp.isfinite(out_bf16)))
    assert float(jnp.max(jnp.abs(out_bf16 - ref))) < 1.0

    print("KERNEL_OK")
</pallas_src>

<mosaic_0001>
module attributes {stable_mosaic.version = 11 : i64} {
  func.func @_fused_ampnet_kernel(%arg0: i32, %arg1: memref<2x8x32xf32, #tpu.memory_space<vmem>>, %arg2: memref<32x256xf32, #tpu.memory_space<vmem>>, %arg3: memref<1x256xf32, #tpu.memory_space<vmem>>, %arg4: memref<4x256xf32, #tpu.memory_space<vmem>>, %arg5: memref<256x256xf32, #tpu.memory_space<vmem>>, %arg6: memref<1x256xf32, #tpu.memory_space<vmem>>, %arg7: memref<4x256xf32, #tpu.memory_space<vmem>>, %arg8: memref<1x256xf32, #tpu.memory_space<vmem>>, %arg9: memref<1x1xf32, #tpu.memory_space<vmem>>, %arg10: memref<8x1xf32, #tpu.memory_space<vmem>>) attributes {dimension_semantics = [#tpu.dimension_semantics<parallel>], iteration_bounds = array<i64: 1>, scalar_prefetch = 0 : i64, scratch_operands = 0 : i64, tpu.core_type = #tpu.core_type<tc>, window_params = [{transform_indices = @transform_0, window_bounds = array<i64: 2, 8, 32>}, {pipeline_mode = #tpu.pipeline_mode<synchronous>, transform_indices = @transform_1, window_bounds = array<i64: 32, 256>}, {pipeline_mode = #tpu.pipeline_mode<synchronous>, transform_indices = @transform_2, window_bounds = array<i64: 1, 256>}, {pipeline_mode = #tpu.pipeline_mode<synchronous>, transform_indices = @transform_3, window_bounds = array<i64: 4, 256>}, {pipeline_mode = #tpu.pipeline_mode<synchronous>, transform_indices = @transform_4, window_bounds = array<i64: 256, 256>}, {pipeline_mode = #tpu.pipeline_mode<synchronous>, transform_indices = @transform_5, window_bounds = array<i64: 1, 256>}, {pipeline_mode = #tpu.pipeline_mode<synchronous>, transform_indices = @transform_6, window_bounds = array<i64: 4, 256>}, {pipeline_mode = #tpu.pipeline_mode<synchronous>, transform_indices = @transform_7, window_bounds = array<i64: 1, 256>}, {pipeline_mode = #tpu.pipeline_mode<synchronous>, transform_indices = @transform_8, window_bounds = array<i64: 1, 1>}, {transform_indices = @transform_9, window_bounds = array<i64: 8, 1>}]} {
    %c0 = arith.constant 0 : index
    %c0_0 = arith.constant 0 : index
    %c0_1 = arith.constant 0 : index
    %0 = vector.load %arg1[%c0, %c0_0, %c0_1] : memref<2x8x32xf32, #tpu.memory_space<vmem>>, vector<2x8x32xf32>
    %1 = vector.shape_cast %0 : vector<2x8x32xf32> to vector<16x32xf32>
    %c0_2 = arith.constant 0 : index
    %c0_3 = arith.constant 0 : index
    %2 = vector.load %arg2[%c0_2, %c0_3] : memref<32x256xf32, #tpu.memory_space<vmem>>, vector<32x256xf32>
    %cst = arith.constant dense<0.000000e+00> : vector<16x256xf32>
    %3 = tpu.matmul %1, %2, %cst {dimension_numbers = #tpu.dot_dimension_numbers<[1], [0], [0], [1], [0, 0, 1, 1], [], []>} : vector<16x32xf32>, vector<32x256xf32>, vector<16x256xf32> -> vector<16x256xf32>
    %c0_4 = arith.constant 0 : index
    %c0_5 = arith.constant 0 : index
    %4 = vector.load %arg3[%c0_4, %c0_5] : memref<1x256xf32, #tpu.memory_space<vmem>>, vector<1x256xf32>
    %5 = vector.broadcast %4 : vector<1x256xf32> to vector<16x256xf32>
    %6 = arith.addf %3, %5 : vector<16x256xf32>
    %cst_6 = arith.constant 0.000000e+00 : f32
    %7 = vector.broadcast %cst_6 : f32 to vector<16x256xf32>
    %8 = arith.maximumf %6, %7 : vector<16x256xf32>
    %9 = vector.extract_strided_slice %8 {offsets = [0, 0], sizes = [16, 128], strides = [1, 1]} : vector<16x256xf32> to vector<16x128xf32>
    %cst_7 = arith.constant dense<0.000000e+00> : vector<16xf32>
    %10 = vector.multi_reduction <add>, %9, %cst_7 [1] : vector<16x128xf32> to vector<16xf32>
    %11 = vector.shape_cast %10 : vector<16xf32> to vector<16x1xf32>
    %cst_8 = arith.constant 7.812500e-03 : f32
    %12 = vector.broadcast %cst_8 : f32 to vector<16x1xf32>
    %13 = arith.mulf %11, %12 : vector<16x1xf32>
    %14 = vector.broadcast %13 : vector<16x1xf32> to vector<16x128xf32>
    %15 = arith.subf %9, %14 : vector<16x128xf32>
    %16 = arith.mulf %15, %15 : vector<16x128xf32>
    %cst_9 = arith.constant dense<0.000000e+00> : vector<16xf32>
    %17 = vector.multi_reduction <add>, %16, %cst_9 [1] : vector<16x128xf32> to vector<16xf32>
    %18 = vector.shape_cast %17 : vector<16xf32> to vector<16x1xf32>
    %cst_10 = arith.constant 7.812500e-03 : f32
    %19 = vector.broadcast %cst_10 : f32 to vector<16x1xf32>
    %20 = arith.mulf %18, %19 : vector<16x1xf32>
    %cst_11 = arith.constant 9.99999974E-6 : f32
    %21 = vector.broadcast %cst_11 : f32 to vector<16x1xf32>
    %22 = arith.addf %20, %21 : vector<16x1xf32>
    %23 = math.rsqrt %22 : vector<16x1xf32>
    %24 = vector.broadcast %23 : vector<16x1xf32> to vector<16x128xf32>
    %25 = arith.mulf %15, %24 : vector<16x128xf32>
    %26 = vector.extract_strided_slice %8 {offsets = [0, 128], sizes = [16, 128], strides = [1, 1]} : vector<16x256xf32> to vector<16x128xf32>
    %cst_12 = arith.constant dense<0.000000e+00> : vector<16xf32>
    %27 = vector.multi_reduction <add>, %26, %cst_12 [1] : vector<16x128xf32> to vector<16xf32>
    %28 = vector.shape_cast %27 : vector<16xf32> to vector<16x1xf32>
    %cst_13 = arith.constant 7.812500e-03 : f32
    %29 = vector.broadcast %cst_13 : f32 to vector<16x1xf32>
    %30 = arith.mulf %28, %29 : vector<16x1xf32>
    %31 = vector.broadcast %30 : vector<16x1xf32> to vector<16x128xf32>
    %32 = arith.subf %26, %31 : vector<16x128xf32>
    %33 = arith.mulf %32, %32 : vector<16x128xf32>
    %cst_14 = arith.constant dense<0.000000e+00> : vector<16xf32>
    %34 = vector.multi_reduction <add>, %33, %cst_14 [1] : vector<16x128xf32> to vector<16xf32>
    %35 = vector.shape_cast %34 : vector<16xf32> to vector<16x1xf32>
    %cst_15 = arith.constant 7.812500e-03 : f32
    %36 = vector.broadcast %cst_15 : f32 to vector<16x1xf32>
    %37 = arith.mulf %35, %36 : vector<16x1xf32>
    %cst_16 = arith.constant 9.99999974E-6 : f32
    %38 = vector.broadcast %cst_16 : f32 to vector<16x1xf32>
    %39 = arith.addf %37, %38 : vector<16x1xf32>
    %40 = math.rsqrt %39 : vector<16x1xf32>
    %41 = vector.broadcast %40 : vector<16x1xf32> to vector<16x128xf32>
    %42 = arith.mulf %32, %41 : vector<16x128xf32>
    %43 = tpu.concatenate %25, %42 in 1 : vector<16x128xf32>, vector<16x128xf32> -> vector<16x256xf32>
    %c0_17 = arith.constant 0 : index
    %c0_18 = arith.constant 0 : index
    %44 = vector.load %arg4[%c0_17, %c0_18] : memref<4x256xf32, #tpu.memory_space<vmem>>, vector<4x256xf32>
    %45 = vector.extract_strided_slice %44 {offsets = [0, 0], sizes = [2, 256], strides = [1, 1]} : vector<4x256xf32> to vector<2x256xf32>
    %46 = vector.shape_cast %45 : vector<2x256xf32> to vector<2x1x256xf32>
    %47 = vector.extract_strided_slice %44 {offsets = [2, 0], sizes = [2, 256], strides = [1, 1]} : vector<4x256xf32> to vector<2x256xf32>
    %48 = vector.shape_cast %47 : vector<2x256xf32> to vector<2x1x256xf32>
    %49 = vector.shape_cast %43 : vector<16x256xf32> to vector<2x8x256xf32>
    %50 = vector.broadcast %46 : vector<2x1x256xf32> to vector<2x8x256xf32>
    %51 = arith.mulf %49, %50 : vector<2x8x256xf32>
    %52 = vector.broadcast %48 : vector<2x1x256xf32> to vector<2x8x256xf32>
    %53 = arith.addf %51, %52 : vector<2x8x256xf32>
    %54 = vector.shape_cast %53 : vector<2x8x256xf32> to vector<16x256xf32>
    %c0_19 = arith.constant 0 : index
    %c0_20 = arith.constant 0 : index
    %55 = vector.load %arg5[%c0_19, %c0_20] : memref<256x256xf32, #tpu.memory_space<vmem>>, vector<256x256xf32>
    %cst_21 = arith.constant dense<0.000000e+00> : vector<16x256xf32>
    %56 = tpu.matmul %54, %55, %cst_21 {dimension_numbers = #tpu.dot_dimension_numbers<[1], [0], [0], [1], [0, 0, 1, 1], [], []>} : vector<16x256xf32>, vector<256x256xf32>, vector<16x256xf32> -> vector<16x256xf32>
    %c0_22 = arith.constant 0 : index
    %c0_23 = arith.constant 0 : index
    %57 = vector.load %arg6[%c0_22, %c0_23] : memref<1x256xf32, #tpu.memory_space<vmem>>, vector<1x256xf32>
    %58 = vector.broadcast %57 : vector<1x256xf32> to vector<16x256xf32>
    %59 = arith.addf %56, %58 : vector<16x256xf32>
    %cst_24 = arith.constant 0.000000e+00 : f32
    %60 = vector.broadcast %cst_24 : f32 to vector<16x256xf32>
    %61 = arith.maximumf %59, %60 : vector<16x256xf32>
    %62 = vector.extract_strided_slice %61 {offsets = [0, 0], sizes = [16, 128], strides = [1, 1]} : vector<16x256xf32> to vector<16x128xf32>
    %cst_25 = arith.constant dense<0.000000e+00> : vector<16xf32>
    %63 = vector.multi_reduction <add>, %62, %cst_25 [1] : vector<16x128xf32> to vector<16xf32>
    %64 = vector.shape_cast %63 : vector<16xf32> to vector<16x1xf32>
    %cst_26 = arith.constant 7.812500e-03 : f32
    %65 = vector.broadcast %cst_26 : f32 to vector<16x1xf32>
    %66 = arith.mulf %64, %65 : vector<16x1xf32>
    %67 = vector.broadcast %66 : vector<16x1xf32> to vector<16x128xf32>
    %68 = arith.subf %62, %67 : vector<16x128xf32>
    %69 = arith.mulf %68, %68 : vector<16x128xf32>
    %cst_27 = arith.constant dense<0.000000e+00> : vector<16xf32>
    %70 = vector.multi_reduction <add>, %69, %cst_27 [1] : vector<16x128xf32> to vector<16xf32>
    %71 = vector.shape_cast %70 : vector<16xf32> to vector<16x1xf32>
    %cst_28 = arith.constant 7.812500e-03 : f32
    %72 = vector.broadcast %cst_28 : f32 to vector<16x1xf32>
    %73 = arith.mulf %71, %72 : vector<16x1xf32>
    %cst_29 = arith.constant 9.99999974E-6 : f32
    %74 = vector.broadcast %cst_29 : f32 to vector<16x1xf32>
    %75 = arith.addf %73, %74 : vector<16x1xf32>
    %76 = math.rsqrt %75 : vector<16x1xf32>
    %77 = vector.broadcast %76 : vector<16x1xf32> to vector<16x128xf32>
    %78 = arith.mulf %68, %77 : vector<16x128xf32>
    %79 = vector.extract_strided_slice %61 {offsets = [0, 128], sizes = [16, 128], strides = [1, 1]} : vector<16x256xf32> to vector<16x128xf32>
    %cst_30 = arith.constant dense<0.000000e+00> : vector<16xf32>
    %80 = vector.multi_reduction <add>, %79, %cst_30 [1] : vector<16x128xf32> to vector<16xf32>
    %81 = vector.shape_cast %80 : vector<16xf32> to vector<16x1xf32>
    %cst_31 = arith.constant 7.812500e-03 : f32
    %82 = vector.broadcast %cst_31 : f32 to vector<16x1xf32>
    %83 = arith.mulf %81, %82 : vector<16x1xf32>
    %84 = vector.broadcast %83 : vector<16x1xf32> to vector<16x128xf32>
    %85 = arith.subf %79, %84 : vector<16x128xf32>
    %86 = arith.mulf %85, %85 : vector<16x128xf32>
    %cst_32 = arith.constant dense<0.000000e+00> : vector<16xf32>
    %87 = vector.multi_reduction <add>, %86, %cst_32 [1] : vector<16x128xf32> to vector<16xf32>
    %88 = vector.shape_cast %87 : vector<16xf32> to vector<16x1xf32>
    %cst_33 = arith.constant 7.812500e-03 : f32
    %89 = vector.broadcast %cst_33 : f32 to vector<16x1xf32>
    %90 = arith.mulf %88, %89 : vector<16x1xf32>
    %cst_34 = arith.constant 9.99999974E-6 : f32
    %91 = vector.broadcast %cst_34 : f32 to vector<16x1xf32>
    %92 = arith.addf %90, %91 : vector<16x1xf32>
    %93 = math.rsqrt %92 : vector<16x1xf32>
    %94 = vector.broadcast %93 : vector<16x1xf32> to vector<16x128xf32>
    %95 = arith.mulf %85, %94 : vector<16x128xf32>
    %96 = tpu.concatenate %78, %95 in 1 : vector<16x128xf32>, vector<16x128xf32> -> vector<16x256xf32>
    %c0_35 = arith.constant 0 : index
    %c0_36 = arith.constant 0 : index
    %97 = vector.load %arg7[%c0_35, %c0_36] : memref<4x256xf32, #tpu.memory_space<vmem>>, vector<4x256xf32>
    %98 = vector.extract_strided_slice %97 {offsets = [0, 0], sizes = [2, 256], strides = [1, 1]} : vector<4x256xf32> to vector<2x256xf32>
    %99 = vector.shape_cast %98 : vector<2x256xf32> to vector<2x1x256xf32>
    %100 = vector.extract_strided_slice %97 {offsets = [2, 0], sizes = [2, 256], strides = [1, 1]} : vector<4x256xf32> to vector<2x256xf32>
    %101 = vector.shape_cast %100 : vector<2x256xf32> to vector<2x1x256xf32>
    %102 = vector.shape_cast %96 : vector<16x256xf32> to vector<2x8x256xf32>
    %103 = vector.broadcast %99 : vector<2x1x256xf32> to vector<2x8x256xf32>
    %104 = arith.mulf %102, %103 : vector<2x8x256xf32>
    %105 = vector.broadcast %101 : vector<2x1x256xf32> to vector<2x8x256xf32>
    %106 = arith.addf %104, %105 : vector<2x8x256xf32>
    %107 = vector.shape_cast %106 : vector<2x8x256xf32> to vector<16x256xf32>
    %108 = vector.extract_strided_slice %107 {offsets = [0, 0], sizes = [8, 256], strides = [1, 1]} : vector<16x256xf32> to vector<8x256xf32>
    %109 = vector.extract_strided_slice %107 {offsets = [8, 0], sizes = [8, 256], strides = [1, 1]} : vector<16x256xf32> to vector<8x256xf32>
    %110 = arith.addf %108, %109 : vector<8x256xf32>
    %c0_37 = arith.constant 0 : index
    %c0_38 = arith.constant 0 : index
    %111 = vector.load %arg8[%c0_37, %c0_38] : memref<1x256xf32, #tpu.memory_space<vmem>>, vector<1x256xf32>
    %112 = vector.broadcast %111 : vector<1x256xf32> to vector<8x256xf32>
    %113 = arith.mulf %110, %112 : vector<8x256xf32>
    %cst_39 = arith.constant dense<0.000000e+00> : vector<8xf32>
    %114 = vector.multi_reduction <add>, %113, %cst_39 [1] : vector<8x256xf32> to vector<8xf32>
    %115 = vector.shape_cast %114 : vector<8xf32> to vector<8x1xf32>
    %c0_40 = arith.constant 0 : index
    %c0_41 = arith.constant 0 : index
    %116 = vector.load %arg9[%c0_40, %c0_41] : memref<1x1xf32, #tpu.memory_space<vmem>>, vector<1x1xf32>
    %cst_42 = arith.constant 2.000000e+00 : f32
    %117 = vector.broadcast %cst_42 : f32 to vector<1x1xf32>
    %118 = arith.mulf %117, %116 : vector<1x1xf32>
    %119 = vector.broadcast %118 : vector<1x1xf32> to vector<8x1xf32>
    %120 = arith.addf %115, %119 : vector<8x1xf32>
    %c0_43 = arith.constant 0 : index
    %c0_44 = arith.constant 0 : index
    %121 = vector.load %arg10[%c0_43, %c0_44] : memref<8x1xf32, #tpu.memory_space<vmem>>, vector<8x1xf32>
    tpu.vector_store %arg10[%c0_43, %c0_44], %120 {strides = array<i32>} : memref<8x1xf32, #tpu.memory_space<vmem>>, vector<8x1xf32>,
    return
  }
  func.func @transform_0(%arg0: i32) -> (i32, i32, i32) {
    %c0_i32 = arith.constant 0 : i32
    %c0_i32_0 = arith.constant 0 : i32
    %c0_i32_1 = arith.constant 0 : i32
    return %c0_i32, %arg0, %c0_i32_0 : i32, i32, i32
  }
  func.func @transform_1(%arg0: i32) -> (i32, i32) {
    %c0_i32 = arith.constant 0 : i32
    %c0_i32_0 = arith.constant 0 : i32
    %c0_i32_1 = arith.constant 0 : i32
    return %c0_i32, %c0_i32_0 : i32, i32
  }
  func.func @transform_2(%arg0: i32) -> (i32, i32) {
    %c0_i32 = arith.constant 0 : i32
    %c0_i32_0 = arith.constant 0 : i32
    %c0_i32_1 = arith.constant 0 : i32
    return %c0_i32, %c0_i32_0 : i32, i32
  }
  func.func @transform_3(%arg0: i32) -> (i32, i32) {
    %c0_i32 = arith.constant 0 : i32
    %c0_i32_0 = arith.constant 0 : i32
    %c0_i32_1 = arith.constant 0 : i32
    return %c0_i32, %c0_i32_0 : i32, i32
  }
  func.func @transform_4(%arg0: i32) -> (i32, i32) {
    %c0_i32 = arith.constant 0 : i32
    %c0_i32_0 = arith.constant 0 : i32
    %c0_i32_1 = arith.constant 0 : i32
    return %c0_i32, %c0_i32_0 : i32, i32
  }
  func.func @transform_5(%arg0: i32) -> (i32, i32) {
    %c0_i32 = arith.constant 0 : i32
    %c0_i32_0 = arith.constant 0 : i32
    %c0_i32_1 = arith.constant 0 : i32
    return %c0_i32, %c0_i32_0 : i32, i32
  }
  func.func @transform_6(%arg0: i32) -> (i32, i32) {
    %c0_i32 = arith.constant 0 : i32
    %c0_i32_0 = arith.constant 0 : i32
    %c0_i32_1 = arith.constant 0 : i32
    return %c0_i32, %c0_i32_0 : i32, i32
  }
  func.func @transform_7(%arg0: i32) -> (i32, i32) {
    %c0_i32 = arith.constant 0 : i32
    %c0_i32_0 = arith.constant 0 : i32
    %c0_i32_1 = arith.constant 0 : i32
    return %c0_i32, %c0_i32_0 : i32, i32
  }
  func.func @transform_8(%arg0: i32) -> (i32, i32) {
    %c0_i32 = arith.constant 0 : i32
    %c0_i32_0 = arith.constant 0 : i32
    %c0_i32_1 = arith.constant 0 : i32
    return %c0_i32, %c0_i32_0 : i32, i32
  }
  func.func @transform_9(%arg0: i32) -> (i32, i32) {
    %c0_i32 = arith.constant 0 : i32
    %c0_i32_0 = arith.constant 0 : i32
    return %arg0, %c0_i32 : i32, i32
  }
}

</mosaic_0001>

<bundles_post_ra>
// kernel: ampnet_forward.1
= control target key start
LH: loop header
LB: loop body
LE: loop exit
PB: predicated region body
PF: predicated region fallthrough
CT: control target
= control target key end

     0   :  { %s828_s0 = inlined_call_operand.vmem [shape: f32[2,8,32], index: 0, kind: input, shape index: {}]   ;;  %s829_s1 = inlined_call_operand.vmem [shape: f32[32,256], index: 1, kind: input, shape index: {}]   ;;  %s830_s2 = inlined_call_operand.vmem [shape: f32[1,256], index: 2, kind: input, shape index: {}]   ;;  %s831_s3 = inlined_call_operand.vmem [shape: f32[4,256], index: 3, kind: input, shape index: {}]   ;;  %s832_s4 = inlined_call_operand.hbm [shape: f32[256,256], index: 4, kind: input, shape index: {}]   ;;  %s833_s5 = inlined_call_operand.vmem [shape: f32[1,256], index: 5, kind: input, shape index: {}]   ;;  %s834_s6 = inlined_call_operand.vmem [shape: f32[4,256], index: 6, kind: input, shape index: {}]   ;;  %s835_s7 = inlined_call_operand.vmem [shape: f32[1,256], index: 7, kind: input, shape index: {}]   ;;  %s836_s8 = inlined_call_operand.<no memory space> [shape: f32[1,1], index: 8, kind: input, shape index: {}]   ;;  %s837_s9 = inlined_call_operand.vmem [shape: f32[8,1], index: 9, kind: output, shape index: {}]  }
   0x1   :  { %v14_v0 = vstv %s836_s8 }
   0x2   :  { %15 = vst [vmem:[#allocation2] sm:$0x1] %v14_v0 }
   0x3   :  { %16 = vsyncpa [#allocation4], 0  ;;  %s633_s11 = smov [#allocation3]  }
   0x4   :  { %s30_s12 = sshll.u32 %s633_s11, 4  ;;  %s31_s12 = int_to_ptr.vmem [resolvable:$true] %s30_s12 }
   0x5   :  { %s619_s13 = scalar_lea.vmem %s31_s12, 8192  ;;  %p624_p1 = scmp.lt.s32.totalorder %s31_s12, %s31_s12 }
   0x6   :  { %p620_p0 = scmp.ne.s32.totalorder %s31_s12, %s619_s13  ;;  %p625_p2 = scmp.lt.s32.totalorder %s619_s13, %s619_s13 }
   0x8   :  { %p626_p3 = por %p625_p2, %p624_p1 }
   0xa   :  { %p627_p4 = pnand %p626_p3, %p620_p0 }
   0xc   :  { %630 = shalt.err (!%p627_p4)
}
   0xd   :  { %s634_s14 = smov 256   ;;  %s635_s15 = smov 16  }
   0xe   :  { %36 = dma.hbm_to_vmem [thread:$0]  %s832_s4, 8192, %s31_s12, [#allocation4], %s634_s14, %s634_s14, %s635_s15  }
   0xf   :  { %631 = dma.done.wait [#allocation4], 8192  }
  0x10   :  { %632 = vsyncadd [#allocation4], 4294959104  ;;  %v636_v1 = vmov 0.0   ;;  %v57_v2 = vld [vmem:[%s829_s1 + $0x38] sm:$0xff]  ;;  %v56_v3 = vld [vmem:[%s829_s1 + $0x30] sm:$0xff]  ;;  %vm70_vm0 = vcmask 261120   ;;  %v60_v12 = vlaneseq }
  0x11   :  { %141 = vmatprep.mubr.f32.mxu0 %v636_v1  ;;  %v55_v4 = vld [vmem:[%s829_s1 + $0x28] sm:$0xff]  ;;  %101 = vmatprep.subr.mxu0 %v57_v2  ;;  %v54_v5 = vld [vmem:[%s829_s1 + $0x20] sm:$0xff]  ;;  %v53_v6 = vld [vmem:[%s829_s1 + $0x18] sm:$0xff]  ;;  %vm579_vm1 = vcmask 7168  }
  0x12   :  { %102 = vmatpush1.msra.mxu0 %v56_v3  ;;  %v52_v7 = vld [vmem:[%s829_s1 + $0x10] sm:$0xff]  ;;  %v51_v8 = vld [vmem:[%s829_s1 + $0x8] sm:$0xff]  ;;  %v50_v9 = vld [vmem:[%s829_s1] sm:$0xff]  ;;  %v724_v13 = vshrl.u32 %v60_v12, 7 }
  0x13   :  { %103 = vmatprep.subr.mxu0 %v55_v4  ;;  %v48_v10 = vld [vmem:[%s828_s0] sm:$0xff]  ;;  %v49_v11 = vld [vmem:[%s828_s0 + $0x8] sm:$0xff]  ;;  %v306_v32 = vld [vmem:[#allocation3 + $0xf0] sm:$0xff] }
  0x14   :  { %104 = vmatpush1.msra.mxu0 %v54_v5  ;;  %v727_v14 = vsub.s32 1, %v724_v13  ;;  %v730_v15 = vsub.s32 0, %v724_v13  ;;  %v58_v16 = vld [vmem:[%s830_s2] sm:$0x3]  ;;  %v305_v33 = vld [vmem:[#allocation3 + $0xe8] sm:$0xff]  ;;  %v302_v36 = vld [vmem:[#allocation3 + $0xd0] sm:$0xff] }
  0x15   :  { %105 = vmatprep.subr.mxu0 %v53_v6  ;;  %v307_v31 = vld [vmem:[#allocation3 + $0xf8] sm:$0xff]  ;;  %v304_v34 = vld [vmem:[#allocation3 + $0xe0] sm:$0xff]  ;;  %v301_v37 = vld [vmem:[#allocation3 + $0xc8] sm:$0xff] }
  0x16   :  { %106 = vmatpush1.msra.mxu0 %v52_v7  ;;  %v67_v17 = vrot.slane %v58_v16, %v727_v14  ;;  %v63_v19 = vrot.slane %v58_v16, %v730_v15  ;;  %352 = vmatprep.subr.mxu1 %v307_v31  ;;  %v303_v35 = vld [vmem:[#allocation3 + $0xd8] sm:$0xff]  ;;  %v300_v38 = vld [vmem:[#allocation3 + $0xc0] sm:$0xff]  ;;  %v298_v40 = vld [vmem:[#allocation3 + $0xb0] sm:$0xff] }
  0x17   :  { %107 = vmatprep.subr.mxu0 %v51_v8  ;;  %353 = vmatpush1.msra.mxu1 %v306_v32  ;;  %v299_v39 = vld [vmem:[#allocation3 + $0xb8] sm:$0xff]  ;;  %v297_v41 = vld [vmem:[#allocation3 + $0xa8] sm:$0xff]  ;;  %v296_v42 = vld [vmem:[#allocation3 + $0xa0] sm:$0xff] }
  0x18   :  { %108 = vmatpush1.msra.mxu0 %v50_v9  ;;  %354 = vmatprep.subr.mxu1 %v305_v33  ;;  %v295_v43 = vld [vmem:[#allocation3 + $0x98] sm:$0xff]  ;;  %v294_v44 = vld [vmem:[#allocation3 + $0x90] sm:$0xff]  ;;  %v293_v45 = vld [vmem:[#allocation3 + $0x88] sm:$0xff] }
  0x19   :  { %586 = vmatmul.mubr.msk.f32.vlgmr.msra.gmra.mxu0 %vm70_vm0, %v48_v10  ;;  %355 = vmatpush1.msra.mxu1 %v304_v34  ;;  %v292_v46 = vld [vmem:[#allocation3 + $0x80] sm:$0xff]  ;;  %v291_v47 = vld [vmem:[#allocation3 + $0x78] sm:$0xff]  ;;  %v290_v48 = vld [vmem:[#allocation3 + $0x70] sm:$0xff] }
  0x1a   :  { %147 = vmatprep.mubr.f32.mxu0 %v636_v1  ;;  %356 = vmatprep.subr.mxu1 %v303_v35  ;;  %v289_v49 = vld [vmem:[#allocation3 + $0x68] sm:$0xff]  ;;  %v288_v50 = vld [vmem:[#allocation3 + $0x60] sm:$0xff]  ;;  %v287_v51 = vld [vmem:[#allocation3 + $0x58] sm:$0xff] }
  0x1b   :  { %357 = vmatpush1.msra.mxu1 %v302_v36  ;;  %v286_v52 = vld [vmem:[#allocation3 + $0x50] sm:$0xff]  ;;  %v285_v53 = vld [vmem:[#allocation3 + $0x48] sm:$0xff]  ;;  %v284_v54 = vld [vmem:[#allocation3 + $0x40] sm:$0xff] }
  0x1c   :  { %358 = vmatprep.subr.mxu1 %v301_v37  ;;  %v283_v55 = vld [vmem:[#allocation3 + $0x38] sm:$0xff]  ;;  %v282_v56 = vld [vmem:[#allocation3 + $0x30] sm:$0xff]  ;;  %v281_v57 = vld [vmem:[#allocation3 + $0x28] sm:$0xff] }
  0x1d   :  { %587 = vmatmul.mubr.msk.f32.gmra.mxu0 %vm70_vm0, %v49_v11  ;;  %359 = vmatpush1.msra.mxu1 %v300_v38  ;;  %v280_v58 = vld [vmem:[#allocation3 + $0x20] sm:$0xff]  ;;  %v279_v59 = vld [vmem:[#allocation3 + $0x18] sm:$0xff]  ;;  %v278_v60 = vld [vmem:[#allocation3 + $0x10] sm:$0xff] }
  0x1e   :  { %360 = vmatprep.subr.mxu1 %v299_v39  ;;  %v277_v61 = vld [vmem:[#allocation3 + $0x8] sm:$0xff]  ;;  %v276_v62 = vld [vmem:[#allocation3] sm:$0xff]  ;;  %v339_v63 = vld [vmem:[#allocation3 + $0x1f8] sm:$0xff] }
  0x1f   :  { %361 = vmatpush1.msra.mxu1 %v298_v40  ;;  %v338_v0 = vld [vmem:[#allocation3 + $0x1f0] sm:$0xff]  ;;  %v337_v1 = vld [vmem:[#allocation3 + $0x1e8] sm:$0xff]  ;;  %v336_v2 = vld [vmem:[#allocation3 + $0x1e0] sm:$0xff] }
  0x20   :  { %362 = vmatprep.subr.mxu1 %v297_v41  ;;  %v326_v31 = vld [vmem:[#allocation3 + $0x190] sm:$0xff]  ;;  %v325_v32 = vld [vmem:[#allocation3 + $0x188] sm:$0xff]  ;;  %v324_v33 = vld [vmem:[#allocation3 + $0x180] sm:$0xff] }
  0x21   :  { %363 = vmatpush1.msra.mxu1 %v296_v42  ;;  %v323_v34 = vld [vmem:[#allocation3 + $0x178] sm:$0xff]  ;;  %v322_v35 = vld [vmem:[#allocation3 + $0x170] sm:$0xff]  ;;  %v321_v36 = vld [vmem:[#allocation3 + $0x168] sm:$0xff] }
  0x22   :  { %364 = vmatprep.subr.mxu1 %v295_v43  ;;  %v320_v37 = vld [vmem:[#allocation3 + $0x160] sm:$0xff]  ;;  %v319_v38 = vld [vmem:[#allocation3 + $0x158] sm:$0xff]  ;;  %v318_v39 = vld [vmem:[#allocation3 + $0x150] sm:$0xff] }
  0x23   :  { %365 = vmatpush1.msra.mxu1 %v294_v44  ;;  %v317_v40 = vld [vmem:[#allocation3 + $0x148] sm:$0xff]  ;;  %v316_v41 = vld [vmem:[#allocation3 + $0x140] sm:$0xff]  ;;  %v315_v42 = vld [vmem:[#allocation3 + $0x138] sm:$0xff] }
  0x24   :  { %366 = vmatprep.subr.mxu1 %v293_v45  ;;  %v314_v43 = vld [vmem:[#allocation3 + $0x130] sm:$0xff]  ;;  %v313_v44 = vld [vmem:[#allocation3 + $0x128] sm:$0xff]  ;;  %v312_v45 = vld [vmem:[#allocation3 + $0x120] sm:$0xff] }
  0x25   :  { %367 = vmatpush1.msra.mxu1 %v292_v46  ;;  %v311_v46 = vld [vmem:[#allocation3 + $0x118] sm:$0xff] }
  0x26   :  { %368 = vmatprep.subr.mxu1 %v291_v47  ;;  %v310_v47 = vld [vmem:[#allocation3 + $0x110] sm:$0xff] }
  0x27   :  { %369 = vmatpush1.msra.mxu1 %v290_v48  ;;  %v309_v48 = vld [vmem:[#allocation3 + $0x108] sm:$0xff] }
  0x28   :  { %370 = vmatprep.subr.mxu1 %v289_v49  ;;  %v308_v49 = vld [vmem:[#allocation3 + $0x100] sm:$0xff] }
  0x29   :  { %371 = vmatpush1.msra.mxu1 %v288_v50  ;;  %v637_v50 = vmov 1966171168  }
  0x2a   :  { %372 = vmatprep.subr.mxu1 %v287_v51  ;;  %v213_v51 = vunpack.c.l.s4 %v637_v50 }
  0x2b   :  { %373 = vmatpush1.msra.mxu1 %v286_v52 }
  0x2c   :  { %374 = vmatprep.subr.mxu1 %v285_v53 }
  0x2d   :  { %375 = vmatpush1.msra.mxu1 %v284_v54 }
  0x2e   :  { %376 = vmatprep.subr.mxu1 %v283_v55  ;;  %v214_v55 = vunpack.c.0.s8 %v213_v51 }
  0x2f   :  { %377 = vmatpush1.msra.mxu1 %v282_v56 }
  0x30   :  { %378 = vmatprep.subr.mxu1 %v281_v57 }
  0x31   :  { %379 = vmatpush1.msra.mxu1 %v280_v58 }
  0x32   :  { %380 = vmatprep.subr.mxu1 %v279_v59 }
  0x33   :  { %381 = vmatpush1.msra.mxu1 %v278_v60 }
  0x34   :  { %382 = vmatprep.subr.mxu1 %v277_v61 }
  0x35   :  { %383 = vmatpush1.msra.mxu1 %v276_v62  ;;  %v782_v62 = vsub.s32 %v214_v55, %v724_v13 }
  0x36   :  { %384 = vmatprep.subr.mxu1 %v339_v63 }
  0x37   :  { %385 = vmatpush2.msra.mxu1 %v338_v0  ;;  %v588_v0 = vld.sshfl [vmem:[%s831_s3] sm:$0xff pattern:$0x75316420] }
  0x38   :  { %386 = vmatprep.subr.mxu1 %v337_v1 }
  0x39   :  { %387 = vmatpush2.msra.mxu1 %v336_v2 }
  0xd9   :  { %v143_v18 = vpop.f32.mrf.mxu0 }
  0xda   :  { %v739_v23 = vadd.f32 %v143_v18, %v63_v19 }
  0xdb   :  { %v145_v20 = vpop.f32.mrf.mxu0 }
  0xdc   :  { %v737_v21 = vadd.f32 %v145_v20, %v67_v17  ;;  %v154_v27 = vmax.f32 %v739_v23, 0.0  ;;  %v334_v23 = vld [vmem:[#allocation3 + $0x1d0] sm:$0xff] }
  0xdd   :  { %v149_v22 = vpop.f32.mrf.mxu0 }
  0xde   :  { %v155_v24 = vmax.f32 %v737_v21, 0.0  ;;  %v747_v28 = vadd.f32 %v149_v22, %v63_v19  ;;  %v335_v22 = vld [vmem:[#allocation3 + $0x1d8] sm:$0xff] }
  0xdf   :  { %v151_v25 = vpop.f32.mrf.mxu0  ;;  %388 = vmatprep.subr.mxu1 %v335_v22 }
  0xe0   :  { %v742_v26 = vadd.f32 %v151_v25, %v67_v17  ;;  %180 = vadd.xlane.f32.xlu0 %v155_v24  ;;  %v156_v30 = vmax.f32 %v747_v28, 0.0  ;;  %389 = vmatpush2.msra.mxu1 %v334_v23  ;;  %v332_v25 = vld [vmem:[#allocation3 + $0x1c0] sm:$0xff]  ;;  %v329_v28 = vld [vmem:[#allocation3 + $0x1a8] sm:$0xff] }
  0xe2   :  { %v157_v29 = vmax.f32 %v742_v26, 0.0  ;;  %v331_v26 = vld [vmem:[#allocation3 + $0x1b8] sm:$0xff] }
  0xe4   :  { %182 = vadd.xlane.f32.xlu1 %v157_v29  ;;  %158 = vadd.xlane.f32.xlu0 %v154_v27 }
  0xe8   :  { %160 = vadd.xlane.f32.xlu1 %v156_v30 }
 0x169   :  { %v181_v3 = vpop.xlane.xlu0 %180 }
 0x16a   :  { %v184_v4 = vmul.f32 0.0078125, %v181_v3  ;;  %v218_v3 = vrot.slane %v588_v0, %v782_v62 }
 0x16c   :  { %v759_v5 = vsub.f32 %v155_v24, %v184_v4  ;;  %v333_v24 = vld [vmem:[#allocation3 + $0x1c8] sm:$0xff]  ;;  %v211_v4 = vcombine.high %v588_v0, %v588_v0 }
 0x16d   :  { %v183_v6 = vpop.xlane.xlu1 %182  ;;  %v159_v7 = vpop.xlane.xlu0 %158  ;;  %390 = vmatprep.subr.mxu1 %v333_v24 }
 0x16e   :  { %v185_v8 = vmul.f32 0.0078125, %v183_v6  ;;  %v162_v9 = vmul.f32 0.0078125, %v159_v7  ;;  %v188_v10 = vmul.f32 %v759_v5, %v759_v5  ;;  %391 = vmatpush2.msra.mxu1 %v332_v25  ;;  %v226_v6 = vcombine.high %v218_v3, %v218_v3 }
 0x16f   :  { %392 = vmatprep.subr.mxu1 %v331_v26  ;;  %v225_v7 = vrot.slane %v211_v4, %v782_v62 }
 0x170   :  { %v765_v11 = vsub.f32 %v157_v29, %v185_v8  ;;  %v769_v12 = vsub.f32 %v154_v27, %v162_v9  ;;  %190 = vadd.xlane.f32.xlu0 %v188_v10  ;;  %v330_v27 = vld [vmem:[#allocation3 + $0x1b0] sm:$0xff]  ;;  %v328_v29 = vld [vmem:[#allocation3 + $0x1a0] sm:$0xff]  ;;  %v235_v8 = vrot.slane %v218_v3, %v727_v14  ;;  %v259_v10 = vrot.slane %v226_v6, %v727_v14 }
 0x171   :  { %v161_v16 = vpop.xlane.xlu1 %160  ;;  %393 = vmatpush2.msra.mxu1 %v330_v27  ;;  %v255_v25 = vrot.slane %v226_v6, %v730_v15 }
 0x172   :  { %v163_v17 = vmul.f32 0.0078125, %v161_v16  ;;  %v189_v18 = vmul.f32 %v765_v11, %v765_v11  ;;  %v166_v19 = vmul.f32 %v769_v12, %v769_v12  ;;  %394 = vmatprep.subr.mxu1 %v329_v28  ;;  %v227_v16 = vcombine.high %v225_v7, %v225_v7 }
 0x173   :  { %395 = vmatpush2.msra.mxu1 %v328_v29  ;;  %v239_v28 = vrot.slane %v225_v7, %v730_v15 }
 0x174   :  { %v777_v20 = vsub.f32 %v156_v30, %v163_v17  ;;  %192 = vadd.xlane.f32.xlu0 %v189_v18  ;;  %168 = vadd.xlane.f32.xlu1 %v166_v19  ;;  %v327_v30 = vld [vmem:[#allocation3 + $0x198] sm:$0xff]  ;;  %v231_v18 = vrot.slane %v218_v3, %v730_v15  ;;  %v267_v27 = vrot.slane %v227_v16, %v727_v14 }
 0x175   :  { %396 = vmatprep.subr.mxu1 %v327_v30 }
 0x176   :  { %v167_v21 = vmul.f32 %v777_v20, %v777_v20  ;;  %397 = vmatpush2.msra.mxu1 %v326_v31 }
 0x177   :  { %398 = vmatprep.subr.mxu1 %v325_v32 }
 0x178   :  { %170 = vadd.xlane.f32.xlu1 %v167_v21  ;;  %399 = vmatpush2.msra.mxu1 %v324_v33  ;;  %v243_v21 = vrot.slane %v225_v7, %v727_v14  ;;  %v263_v33 = vrot.slane %v227_v16, %v730_v15 }
 0x179   :  { %400 = vmatprep.subr.mxu1 %v323_v34 }
 0x17a   :  { %401 = vmatpush2.msra.mxu1 %v322_v35 }
 0x17b   :  { %402 = vmatprep.subr.mxu1 %v321_v36 }
 0x17c   :  { %403 = vmatpush2.msra.mxu1 %v320_v37 }
 0x17d   :  { %404 = vmatprep.subr.mxu1 %v319_v38 }
 0x17e   :  { %405 = vmatpush2.msra.mxu1 %v318_v39 }
 0x17f   :  { %406 = vmatprep.subr.mxu1 %v317_v40 }
 0x180   :  { %407 = vmatpush2.msra.mxu1 %v316_v41 }
 0x181   :  { %408 = vmatprep.subr.mxu1 %v315_v42 }
 0x182   :  { %409 = vmatpush2.msra.mxu1 %v314_v43 }
 0x183   :  { %410 = vmatprep.subr.mxu1 %v313_v44 }
 0x184   :  { %411 = vmatpush2.msra.mxu1 %v312_v45 }
 0x185   :  { %412 = vmatprep.subr.mxu1 %v311_v46 }
 0x186   :  { %413 = vmatpush2.msra.mxu1 %v310_v47 }
 0x187   :  { %414 = vmatprep.subr.mxu1 %v309_v48 }
 0x188   :  { %415 = vmatpush2.msra.mxu1 %v308_v49 }
 0x1f9   :  { %v191_v52 = vpop.xlane.xlu0 %190 }
 0x1fa   :  { %v194_v53 = vmul.f32 0.0078125, %v191_v52 }
 0x1fc   :  { %v196_v54 = vadd.f32 1e-05, %v194_v53 }
 0x1fd   :  { %v169_v56 = vpop.xlane.xlu1 %168  ;;  %v193_v57 = vpop.xlane.xlu0 %192 }
 0x1fe   :  { %595 = vrsqrt.f32 %v196_v54  ;;  %v172_v58 = vmul.f32 0.0078125, %v169_v56  ;;  %v195_v59 = vmul.f32 0.0078125, %v193_v57 }
 0x200   :  { %v174_v60 = vadd.f32 1e-05, %v172_v58  ;;  %v197_v61 = vadd.f32 1e-05, %v195_v59 }
 0x201   :  { %v171_v63 = vpop.xlane.xlu1 %170 }
 0x202   :  { %597 = vrsqrt.f32 %v174_v60  ;;  %v173_v1 = vmul.f32 0.0078125, %v171_v63 }
 0x203   :  { %599 = vrsqrt.f32 %v197_v61 }
 0x204   :  { %v175_v2 = vadd.f32 1e-05, %v173_v1 }
 0x206   :  { %601 = vrsqrt.f32 %v175_v2 }
 0x20b   :  { %v596_v13 = vpop.eup %595 }
 0x20c   :  { %v200_v9 = vmul.f32 %v596_v13, %v759_v5 }
 0x20e   :  { %v249_v17 = vmul.f32 %v235_v8, %v200_v9 }
 0x20f   :  { %v598_v19 = vpop.eup %597 }
 0x210   :  { %v600_v22 = vpop.eup %599  ;;  %v273_v23 = vadd.f32 %v259_v10, %v249_v17  ;;  %v178_v24 = vmul.f32 %v598_v19, %v769_v12 }
 0x211   :  { %v201_v26 = vmul.f32 %v600_v22, %v765_v11  ;;  %v340_v11 = vld [vmem:[%s833_s5] sm:$0x3] }
 0x212   :  { %416 = vmatprep.mubr.f32.mxu1 %v273_v23  ;;  %v248_v5 = vmul.f32 %v231_v18, %v178_v24  ;;  %v345_v36 = vrot.slane %v340_v11, %v730_v15  ;;  %v349_v37 = vrot.slane %v340_v11, %v727_v14  ;;  %v589_v18 = vld.sshfl [vmem:[%s834_s6] sm:$0xff pattern:$0x75316420] }
 0x213   :  { %v602_v29 = vpop.eup %601  ;;  %v251_v30 = vmul.f32 %v243_v21, %v201_v26  ;;  %v486_v21 = vcombine.high %v589_v18, %v589_v18  ;;  %v493_v23 = vrot.slane %v589_v18, %v782_v62 }
 0x214   :  { %v272_v31 = vadd.f32 %v255_v25, %v248_v5  ;;  %v179_v32 = vmul.f32 %v602_v29, %v777_v20 }
 0x215   :  { %v275_v34 = vadd.f32 %v267_v27, %v251_v30  ;;  %v500_v22 = vrot.slane %v486_v21, %v782_v62  ;;  %v501_v27 = vcombine.high %v493_v23, %v493_v23  ;;  %v506_v5 = vrot.slane %v493_v23, %v730_v15 }
 0x216   :  { %417 = vmatmul.mubr.f32.vlgmr.msra.gmra.mxu1 %v272_v31  ;;  %v250_v12 = vmul.f32 %v239_v28, %v179_v32  ;;  %v510_v32 = vrot.slane %v493_v23, %v727_v14 }
 0x217   :  { %422 = vmatprep.mubr.f32.mxu1 %v275_v34  ;;  %v502_v25 = vcombine.high %v500_v22, %v500_v22  ;;  %v514_v28 = vrot.slane %v500_v22, %v730_v15  ;;  %v530_v11 = vrot.slane %v501_v27, %v730_v15 }
 0x218   :  { %v274_v35 = vadd.f32 %v263_v33, %v250_v12  ;;  %v518_v12 = vrot.slane %v500_v22, %v727_v14 }
 0x219   :  { %v538_v33 = vrot.slane %v502_v25, %v730_v15 }
 0x21a   :  { %423 = vmatmul.mubr.f32.gmra.mxu1 %v274_v35 }
 0x2d6   :  { %v418_v38 = vpop.f32.mrf.mxu1 }
 0x2d7   :  { %v419_v39 = vadd.f32 %v418_v38, %v345_v36 }
 0x2d8   :  { %v420_v40 = vpop.f32.mrf.mxu1 }
 0x2d9   :  { %v429_v20 = vmax.f32 %v419_v39, 0.0  ;;  %v421_v41 = vadd.f32 %v420_v40, %v349_v37  ;;  %v542_v40 = vrot.slane %v502_v25, %v727_v14 }
 0x2da   :  { %v424_v42 = vpop.f32.mrf.mxu1 }
 0x2db   :  { %v425_v43 = vadd.f32 %v424_v42, %v345_v36  ;;  %433 = vadd.xlane.f32.xlu0 %v429_v20  ;;  %v430_v45 = vmax.f32 %v421_v41, 0.0  ;;  %v553_v41 = vld [vmem:[%s835_s7] sm:$0x3] }
 0x2dc   :  { %v426_v44 = vpop.f32.mrf.mxu1 }
 0x2dd   :  { %v431_v46 = vmax.f32 %v425_v43, 0.0  ;;  %v427_v47 = vadd.f32 %v426_v44, %v349_v37  ;;  %v534_v37 = vrot.slane %v501_v27, %v727_v14  ;;  %v558_v44 = vrot.slane %v553_v41, %v730_v15 }
 0x2df   :  { %455 = vadd.xlane.f32.xlu0 %v430_v45  ;;  %435 = vadd.xlane.f32.xlu1 %v431_v46  ;;  %v432_v48 = vmax.f32 %v427_v47, 0.0 }
 0x2e3   :  { %457 = vadd.xlane.f32.xlu1 %v432_v48 }
 0x364   :  { %v434_v49 = vpop.xlane.xlu0 %433 }
 0x365   :  { %v437_v50 = vmul.f32 0.0078125, %v434_v49 }
 0x367   :  { %v439_v51 = vsub.f32 %v429_v20, %v437_v50 }
 0x368   :  { %v436_v52 = vpop.xlane.xlu1 %435  ;;  %v456_v53 = vpop.xlane.xlu0 %455 }
 0x369   :  { %v438_v54 = vmul.f32 0.0078125, %v436_v52  ;;  %v459_v55 = vmul.f32 0.0078125, %v456_v53  ;;  %v441_v56 = vmul.f32 %v439_v51, %v439_v51  ;;  %v570_v53 = vld [vmem:[#allocation2] sm:$0x1] }
 0x36b   :  { %v440_v57 = vsub.f32 %v431_v46, %v438_v54  ;;  %v461_v58 = vsub.f32 %v430_v45, %v459_v55  ;;  %443 = vadd.xlane.f32.xlu0 %v441_v56  ;;  %v571_v54 = vmul.f32 2.0, %v570_v53 }
 0x36c   :  { %v458_v59 = vpop.xlane.xlu1 %457 }
 0x36d   :  { %v460_v60 = vmul.f32 0.0078125, %v458_v59  ;;  %v442_v61 = vmul.f32 %v440_v57, %v440_v57  ;;  %v463_v63 = vmul.f32 %v461_v58, %v461_v58  ;;  %v576_v55 = vrot.slane %v571_v54, %v730_v15 }
 0x36f   :  { %v462_v0 = vsub.f32 %v432_v48, %v460_v60  ;;  %445 = vadd.xlane.f32.xlu1 %v442_v61  ;;  %465 = vadd.xlane.f32.xlu0 %v463_v63  ;;  %v562_v48 = vrot.slane %v553_v41, %v727_v14 }
 0x371   :  { %v464_v1 = vmul.f32 %v462_v0, %v462_v0 }
 0x373   :  { %467 = vadd.xlane.f32.xlu1 %v464_v1 }
 0x3f4   :  { %v444_v2 = vpop.xlane.xlu0 %443 }
 0x3f5   :  { %v447_v3 = vmul.f32 0.0078125, %v444_v2 }
 0x3f7   :  { %v449_v4 = vadd.f32 1e-05, %v447_v3 }
 0x3f8   :  { %v446_v6 = vpop.xlane.xlu1 %445  ;;  %v466_v7 = vpop.xlane.xlu0 %465 }
 0x3f9   :  { %603 = vrsqrt.f32 %v449_v4  ;;  %v448_v8 = vmul.f32 0.0078125, %v446_v6  ;;  %v469_v13 = vmul.f32 0.0078125, %v466_v7 }
 0x3fb   :  { %v450_v9 = vadd.f32 1e-05, %v448_v8  ;;  %v471_v10 = vadd.f32 1e-05, %v469_v13 }
 0x3fc   :  { %v468_v16 = vpop.xlane.xlu1 %467 }
 0x3fd   :  { %605 = vrsqrt.f32 %v450_v9  ;;  %v470_v17 = vmul.f32 0.0078125, %v468_v16 }
 0x3fe   :  { %607 = vrsqrt.f32 %v471_v10 }
 0x3ff   :  { %v472_v19 = vadd.f32 1e-05, %v470_v17 }
 0x401   :  { %609 = vrsqrt.f32 %v472_v19 }
 0x406   :  { %v604_v24 = vpop.eup %603 }
 0x407   :  { %v453_v26 = vmul.f32 %v604_v24, %v439_v51 }
 0x409   :  { %v523_v35 = vmul.f32 %v506_v5, %v453_v26 }
 0x40a   :  { %v606_v29 = vpop.eup %605 }
 0x40b   :  { %v608_v30 = vpop.eup %607  ;;  %v454_v31 = vmul.f32 %v606_v29, %v440_v57  ;;  %v547_v43 = vadd.f32 %v530_v11, %v523_v35 }
 0x40c   :  { %v475_v34 = vmul.f32 %v608_v30, %v461_v58 }
 0x40d   :  { %v525_v62 = vmul.f32 %v514_v28, %v454_v31 }
 0x40e   :  { %v610_v36 = vpop.eup %609  ;;  %v524_v39 = vmul.f32 %v510_v32, %v475_v34 }
 0x40f   :  { %v476_v38 = vmul.f32 %v610_v36, %v462_v0  ;;  %v549_v20 = vadd.f32 %v538_v33, %v525_v62 }
 0x410   :  { %v548_v45 = vadd.f32 %v534_v37, %v524_v39 }
 0x411   :  { %v526_v42 = vmul.f32 %v518_v12, %v476_v38  ;;  %v551_v47 = vadd.f32 %v549_v20, %v547_v43 }
 0x413   :  { %v550_v46 = vadd.f32 %v542_v40, %v526_v42  ;;  %v565_v50 = vmul.f32 %v558_v44, %v551_v47 }
 0x415   :  { %v552_v49 = vadd.f32 %v550_v46, %v548_v45 }
 0x417   :  { %v566_v51 = vmul.f32 %v562_v48, %v552_v49 }
 0x419   :  { %v567_v52 = vadd.f32 %v566_v51, %v565_v50 }
 0x41b   :  { %568 = vadd.xlane.f32.xlu0 %v567_v52 }
 0x4a4   :  { %v569_v56 = vpop.xlane.xlu0 %568 }
 0x4a5   :  { %v578_v57 = vadd.f32 %v576_v55, %v569_v56 }
 0x4a7   :  { %580 = vst.msk [vmem:[%s837_s9] sm:$0xff] %vm579_vm1, %v578_v57 }
 0x4a8   :  { %585 = vsyncpa [#allocation4], 1 }

</bundles_post_ra>
